<compile_context>
chip_gen: v6e
topology: v6e:2x2x1
jax: 0.10.0
libtpu: 0.0.40
codegen_flags: <defaults>
</compile_context>

<pallas_src>
import functools

import numpy as np
import jax
import jax.numpy as jnp
from jax import lax
from jax.experimental import pallas as pl
from jax.experimental.pallas import tpu as pltpu


# ---------------------------------------------------------------------------
# Constants (reproduced from the PyTorch module)
# ---------------------------------------------------------------------------
BALANCING_WEIGHTS = (1, 1, 2, 5, 10, 30)
RAIN_THRESHOLDS = (0.5, 2, 5, 10, 30)  # mm/h thresholds used in the original repo


def rainfall2pixel(r, a=300, b=1.4):
    z_ = np.log10(r) * b * 10 + 10 * np.log10(a)
    return np.invert(np.round(np.array(z_) / 70 * 255).astype('uint8')) / 255


THRESHOLDS = tuple(float(t) for t in rainfall2pixel(np.array(RAIN_THRESHOLDS), a=300, b=1.4))
WEIGHT_DIFFS = tuple(
    float(BALANCING_WEIGHTS[i + 1] - BALANCING_WEIGHTS[i]) for i in range(len(THRESHOLDS))
)
# Zero-padded / garbage-masked elements rely on min(threshold) > 0 so that
# x == t == 0 gives weight 1 and contribution 0.
assert min(THRESHOLDS) > 0.0

LANES = 512                  # lane-dense last dim (multiple of 128)
DEFAULT_BLOCK_ROWS = 2048    # 2048 x 512 f32 = 4 MiB per input tile
DEFAULT_CHUNK_ROWS = 128     # rows processed per inner fori_loop iteration


def _round_up(x, m):
    return ((x + m - 1) // m) * m


# ---------------------------------------------------------------------------
# Pallas kernel: fused weighting + error, per-block (8, LANES) vector partial
# ---------------------------------------------------------------------------
def _partial_sum_kernel(x_ref, t_ref, out_ref, *, mse_weight, mae_weight,
                        chunk_rows, rows_valid, needs_mask):
    block_rows, lanes = x_ref.shape
    num_chunks = block_rows // chunk_rows
    block_row0 = pl.program_id(0) * block_rows

    unit_weights = (mse_weight == 1.0) and (mae_weight == 1.0)

    def chunk_body(c, acc):
        r0 = pl.multiple_of(c * chunk_rows, chunk_rows)
        x = x_ref[pl.ds(r0, chunk_rows), :].astype(jnp.float32)
        t = t_ref[pl.ds(r0, chunk_rows), :].astype(jnp.float32)

        # weights = 1 + sum_i (bw[i+1]-bw[i]) * (target >= threshold[i])
        # select-add form: one cmp + one select per threshold, pure VPU.
        w = jnp.ones_like(t)
        for thr, dw in zip(THRESHOLDS, WEIGHT_DIFFS):
            if dw != 0.0:
                w = jnp.where(t >= thr, w + dw, w)

        # Fused MSE+MAE: mse_w*d^2 + mae_w*|d| == |d| * (mse_w*|d| + mae_w).
        ad = jnp.abs(x - t)
        if unit_weights:
            err = ad * (ad + 1.0)
        else:
            err = ad * (mse_weight * ad + mae_weight)
        contrib = w * err

        if needs_mask:
            # Row-granular validity mask for the ragged tail of the last
            # (partial) block; invalid rows may contain garbage (incl. NaN),
            # so select (not multiply) them to zero.
            row_ids = (block_row0 + r0
                       + lax.broadcasted_iota(jnp.int32, (chunk_rows, 1), 0))
            contrib = jnp.where(row_ids < rows_valid, contrib, 0.0)

        # Sublane-group reduction: (chunk, L) -> (chunk//8, 8, L), sum leading
        # dim.  Last two dims stay (8, L): free re-view + vreg adds on the VPU,
        # no cross-lane XLU work and no scalar RMW.
        return acc + contrib.reshape(chunk_rows // 8, 8, lanes).sum(axis=0)

    acc = lax.fori_loop(0, num_chunks, chunk_body,
                        jnp.zeros((8, lanes), jnp.float32), unroll=True)
    out_ref[...] = acc


# ---------------------------------------------------------------------------
# Wrapper
# ---------------------------------------------------------------------------
def weighted_mse_mae(inp, tgt, *, mse_weight=1.0, mae_weight=1.0,
                     normal_loss_global_scale=5e-5, LAMBDA=None,
                     block_rows=DEFAULT_BLOCK_ROWS, chunk_rows=DEFAULT_CHUNK_ROWS,
                     lanes=LANES):
    """Pallas equivalent of Weighted_mse_mae.forward (LAMBDA=None path)."""
    # TODO(synk): per-frame LAMBDA re-weighting not implemented (default is None).
    assert LAMBDA is None
    assert inp.shape == tgt.shape and inp.ndim == 5
    S, B, C, H, W = inp.shape
    total = S * B * C * H * W

    # Lane-dense slab.  Zero-copy reshape when numel divides the lane width;
    # otherwise a tiny (< lanes elements) zero pad to the next full row.
    def to_slab(a):
        flat = a.reshape(-1)
        if total % lanes != 0:
            # TODO(synk): this fallback pad materializes a copy; only taken
            # when numel % 512 != 0.
            flat = jnp.pad(flat, (0, lanes - (total % lanes)))
        return flat.reshape(-1, lanes)

    x2 = to_slab(inp)
    t2 = to_slab(tgt)
    rows = x2.shape[0]                      # static

    # Tile geometry: chunk_rows | block_rows, both multiples of 8.
    chunk_rows = min(chunk_rows, _round_up(rows, 8))
    chunk_rows = _round_up(chunk_rows, 8)
    block_rows = min(block_rows, _round_up(rows, chunk_rows))
    block_rows = _round_up(block_rows, chunk_rows)

    num_blocks = pl.cdiv(rows, block_rows)
    needs_mask = (rows % block_rows) != 0   # last block partially out of bounds

    kernel = functools.partial(
        _partial_sum_kernel,
        mse_weight=float(mse_weight),
        mae_weight=float(mae_weight),
        chunk_rows=chunk_rows,
        rows_valid=rows,
        needs_mask=needs_mask,
    )

    # Explicit scoped-VMEM budget: 2 inputs x 2 buffers x tile + headroom,
    # clamped to stay within v7x's 64 MiB physical VMEM (v5e/v6e have 128 MiB).
    itemsize = jnp.dtype(inp.dtype).itemsize
    tile_bytes = block_rows * lanes * itemsize
    vmem_limit = int(min(64 * 1024 * 1024,
                         max(32 * 1024 * 1024, 4 * tile_bytes + 8 * 1024 * 1024)))

    partials = pl.pallas_call(
        kernel,
        out_shape=jax.ShapeDtypeStruct((num_blocks * 8, lanes), jnp.float32),
        grid_spec=pltpu.PrefetchScalarGridSpec(
            num_scalar_prefetch=0,
            grid=(num_blocks,),
            in_specs=[
                pl.BlockSpec((block_rows, lanes), lambda i: (i, 0)),
                pl.BlockSpec((block_rows, lanes), lambda i: (i, 0)),
            ],
            out_specs=pl.BlockSpec((8, lanes), lambda i: (i, 0)),
        ),
        compiler_params=pltpu.CompilerParams(
            # Independent per-block partials, no resident accumulator ->
            # grid axis is safely parallel (TC-shardable on multi-core chips).
            dimension_semantics=("parallel",),
            vmem_limit_bytes=vmem_limit,
        ),
    )(x2, t2)

    # torch.mean over the (S, B) per-frame sums == total_sum / (S*B)
    total_sum = jnp.sum(partials)
    return jnp.float32(normal_loss_global_scale) * total_sum / jnp.float32(S * B)


# ---------------------------------------------------------------------------
# Pure-JAX reference (mirrors the PyTorch forward) for a sanity check
# ---------------------------------------------------------------------------
def _reference(inp, tgt, mse_weight=1.0, mae_weight=1.0, scale=5e-5):
    w = jnp.ones_like(inp) * BALANCING_WEIGHTS[0]
    for i, thr in enumerate(THRESHOLDS):
        w = w + (BALANCING_WEIGHTS[i + 1] - BALANCING_WEIGHTS[i]) * (tgt >= thr).astype(jnp.float32)
    mse = jnp.sum(w * (inp - tgt) ** 2, axis=(2, 3, 4))
    mae = jnp.sum(w * jnp.abs(inp - tgt), axis=(2, 3, 4))
    return scale * (mse_weight * jnp.mean(mse) + mae_weight * jnp.mean(mae))


if __name__ == "__main__":
    key = jax.random.PRNGKey(0)
    k1, k2 = jax.random.split(key)
    S, B, C, H, W = 8, 2, 1, 16, 16   # (seq, batch, channels, height, width)
    inp = jax.random.uniform(k1, (S, B, C, H, W), dtype=jnp.float32)
    tgt = jax.random.uniform(k2, (S, B, C, H, W), dtype=jnp.float32)

    loss = weighted_mse_mae(inp, tgt)
    loss = jax.block_until_ready(loss)

    ref = jax.block_until_ready(_reference(inp, tgt))
    assert np.allclose(np.asarray(loss), np.asarray(ref), rtol=3e-5, atol=1e-7), (loss, ref)

    print("KERNEL_OK")
</pallas_src>

<mosaic_0001>
module attributes {stable_mosaic.version = 11 : i64} {
  func.func @_partial_sum_kernel(%arg0: i32, %arg1: memref<8x512xf32, #tpu.memory_space<vmem>>, %arg2: memref<8x512xf32, #tpu.memory_space<vmem>>, %arg3: memref<8x512xf32, #tpu.memory_space<vmem>>) attributes {dimension_semantics = [#tpu.dimension_semantics<parallel>], iteration_bounds = array<i64: 1>, scalar_prefetch = 0 : i64, scratch_operands = 0 : i64, tpu.core_type = #tpu.core_type<tc>, window_params = [{transform_indices = @transform_0, window_bounds = array<i64: 8, 512>}, {transform_indices = @transform_1, window_bounds = array<i64: 8, 512>}, {transform_indices = @transform_2, window_bounds = array<i64: 8, 512>}]} {
    %cst = arith.constant 0.000000e+00 : f32
    %0 = vector.broadcast %cst : f32 to vector<8x512xf32>
    %c0_i32 = arith.constant 0 : i32
    %c8_i32 = arith.constant 8 : i32
    %1 = arith.muli %c0_i32, %c8_i32 : i32
    %2 = tpu.assume_multiple %1, 8 : i32
    %3 = arith.index_cast %2 : i32 to index
    %c0 = arith.constant 0 : index
    %4 = vector.load %arg1[%3, %c0] : memref<8x512xf32, #tpu.memory_space<vmem>>, vector<8x512xf32>
    %5 = arith.index_cast %2 : i32 to index
    %c0_0 = arith.constant 0 : index
    %6 = vector.load %arg2[%5, %c0_0] : memref<8x512xf32, #tpu.memory_space<vmem>>, vector<8x512xf32>
    %cst_1 = arith.constant 1.000000e+00 : f32
    %7 = vector.broadcast %cst_1 : f32 to vector<8x512xf32>
    %cst_2 = arith.constant 0.58431375 : f32
    %8 = vector.broadcast %cst_2 : f32 to vector<8x512xf32>
    %9 = arith.cmpf oge, %6, %8 : vector<8x512xf32>
    %cst_3 = arith.constant 1.000000e+00 : f32
    %10 = vector.broadcast %cst_3 : f32 to vector<8x512xf32>
    %11 = arith.addf %7, %10 : vector<8x512xf32>
    %12 = arith.select %9, %11, %7 : vector<8x512xi1>, vector<8x512xf32>
    %cst_4 = arith.constant 0.505882382 : f32
    %13 = vector.broadcast %cst_4 : f32 to vector<8x512xf32>
    %14 = arith.cmpf oge, %6, %13 : vector<8x512xf32>
    %cst_5 = arith.constant 3.000000e+00 : f32
    %15 = vector.broadcast %cst_5 : f32 to vector<8x512xf32>
    %16 = arith.addf %12, %15 : vector<8x512xf32>
    %17 = arith.select %14, %16, %12 : vector<8x512xi1>, vector<8x512xf32>
    %cst_6 = arith.constant 0.447058827 : f32
    %18 = vector.broadcast %cst_6 : f32 to vector<8x512xf32>
    %19 = arith.cmpf oge, %6, %18 : vector<8x512xf32>
    %cst_7 = arith.constant 5.000000e+00 : f32
    %20 = vector.broadcast %cst_7 : f32 to vector<8x512xf32>
    %21 = arith.addf %17, %20 : vector<8x512xf32>
    %22 = arith.select %19, %21, %17 : vector<8x512xi1>, vector<8x512xf32>
    %cst_8 = arith.constant 0.349019617 : f32
    %23 = vector.broadcast %cst_8 : f32 to vector<8x512xf32>
    %24 = arith.cmpf oge, %6, %23 : vector<8x512xf32>
    %cst_9 = arith.constant 2.000000e+01 : f32
    %25 = vector.broadcast %cst_9 : f32 to vector<8x512xf32>
    %26 = arith.addf %22, %25 : vector<8x512xf32>
    %27 = arith.select %24, %26, %22 : vector<8x512xi1>, vector<8x512xf32>
    %28 = arith.subf %4, %6 : vector<8x512xf32>
    %29 = math.absf %28 : vector<8x512xf32>
    %cst_10 = arith.constant 1.000000e+00 : f32
    %30 = vector.broadcast %cst_10 : f32 to vector<8x512xf32>
    %31 = arith.addf %29, %30 : vector<8x512xf32>
    %32 = arith.mulf %29, %31 : vector<8x512xf32>
    %33 = arith.mulf %27, %32 : vector<8x512xf32>
    %34 = vector.shape_cast %33 : vector<8x512xf32> to vector<1x8x512xf32>
    %cst_11 = arith.constant dense<0.000000e+00> : vector<8x512xf32>
    %35 = vector.multi_reduction <add>, %34, %cst_11 [0] : vector<1x8x512xf32> to vector<8x512xf32>
    %36 = arith.addf %0, %35 : vector<8x512xf32>
    %c1_i32 = arith.constant 1 : i32
    %c0_12 = arith.constant 0 : index
    %c0_13 = arith.constant 0 : index
    %37 = vector.load %arg3[%c0_12, %c0_13] : memref<8x512xf32, #tpu.memory_space<vmem>>, vector<8x512xf32>
    tpu.vector_store %arg3[%c0_12, %c0_13], %36 {strides = array<i32>} : memref<8x512xf32, #tpu.memory_space<vmem>>, vector<8x512xf32>,
    return
  }
  func.func @transform_0(%arg0: i32) -> (i32, i32) {
    %c0_i32 = arith.constant 0 : i32
    %c0_i32_0 = arith.constant 0 : i32
    return %arg0, %c0_i32 : i32, i32
  }
  func.func @transform_1(%arg0: i32) -> (i32, i32) {
    %c0_i32 = arith.constant 0 : i32
    %c0_i32_0 = arith.constant 0 : i32
    return %arg0, %c0_i32 : i32, i32
  }
  func.func @transform_2(%arg0: i32) -> (i32, i32) {
    %c0_i32 = arith.constant 0 : i32
    %c0_i32_0 = arith.constant 0 : i32
    return %arg0, %c0_i32 : i32, i32
  }
}

</mosaic_0001>

<bundles_post_ra>
// kernel: tpu_custom_call.1
= control target key start
LH: loop header
LB: loop body
LE: loop exit
PB: predicated region body
PF: predicated region fallthrough
CT: control target
= control target key end

     0   :  { %7 = vsyncpa [#allocation3], 0  ;;  %s242_s0 = inlined_call_operand.hbm [shape: f32[8,512], index: 0, kind: input, shape index: {}]   ;;  %s243_s1 = inlined_call_operand.hbm [shape: f32[8,512], index: 1, kind: input, shape index: {}]   ;;  %s244_s2 = inlined_call_operand.hbm [shape: f32[8,512], index: 2, kind: output, shape index: {}]  }
   0x1   :  { %8 = vsyncpa [#allocation6], 0 }
   0x2   :  { %9 = vsyncpa [#allocation4], 0  ;;  %s211_s9 = smov [#allocation2]   ;;  %s212_s11 = smov [#allocation5]  }
   0x3   :  { %s16_s10 = sshll.u32 %s211_s9, 4  ;;  %s26_s12 = sshll.u32 %s212_s11, 4  ;;  %s17_s10 = int_to_ptr.vmem [resolvable:$true] %s16_s10  ;;  %s27_s12 = int_to_ptr.vmem [resolvable:$true] %s26_s12 }
   0x4   :  { %s153_s13 = scalar_lea.vmem %s17_s10, 512  ;;  %p158_p1 = scmp.lt.s32.totalorder %s17_s10, %s17_s10 }
   0x5   :  { %p154_p0 = scmp.ne.s32.totalorder %s17_s10, %s153_s13  ;;  %p159_p2 = scmp.lt.s32.totalorder %s153_s13, %s153_s13 }
   0x7   :  { %p160_p3 = por %p159_p2, %p158_p1 }
   0x9   :  { %p161_p4 = pnand %p160_p3, %p154_p0 }
   0xb   :  { %164 = shalt.err (!%p161_p4)
}
   0xc   :  { %19 = dma.hbm_to_vmem [thread:$0]  %s242_s0, 512, %s17_s10, [#allocation3]  }
   0xd   :  { %s173_s16 = scalar_lea.vmem %s27_s12, 512  ;;  %p178_p6 = scmp.lt.s32.totalorder %s27_s12, %s27_s12 }
   0xe   :  { %p174_p5 = scmp.ne.s32.totalorder %s27_s12, %s173_s16  ;;  %p179_p7 = scmp.lt.s32.totalorder %s173_s16, %s173_s16 }
  0x10   :  { %p180_p8 = por %p179_p7, %p178_p6 }
  0x12   :  { %p181_p9 = pnand %p180_p8, %p174_p5 }
  0x14   :  { %184 = shalt.err (!%p181_p9)
}
  0x15   :  { %29 = dma.hbm_to_vmem [thread:$0]  %s243_s1, 512, %s27_s12, [#allocation6]  }
  0x16   :  { %205 = dma.done.wait [#allocation3], 512  }
  0x17   :  { %206 = vsyncadd [#allocation3], 4294966784 }
  0x18   :  { %207 = dma.done.wait [#allocation6], 512  }
  0x19   :  { %208 = vsyncadd [#allocation6], 4294966784  ;;  %v39_v0 = vld [vmem:[#allocation2] sm:$0xff]  ;;  %v40_v2 = vld [vmem:[#allocation2 + $0x8] sm:$0xff]  ;;  %v213_v4 = vmov 1.0   ;;  %s214_s0 = smov [#allocation7]  }
  0x1a   :  { %v45_v1 = vld [vmem:[#allocation5] sm:$0xff]  ;;  %v46_v6 = vld [vmem:[#allocation5 + $0x8] sm:$0xff]  ;;  %v41_v7 = vld [vmem:[#allocation2 + $0x10] sm:$0xff]  ;;  %s131_s1 = sshll.u32 %s214_s0, 4  ;;  %s132_s1 = int_to_ptr.vmem [resolvable:$true] %s131_s1 }
  0x1b   :  { %vm49_vm0 = vcmp.ge.f32.partialorder %v45_v1, 0.58431375  ;;  %vm57_vm1 = vcmp.ge.f32.partialorder %v45_v1, 0.5058824  ;;  %v93_v3 = vsub.f32 %v39_v0, %v45_v1  ;;  %vm69_vm2 = vcmp.ge.f32.partialorder %v45_v1, 0.44705883  ;;  %p190_p11 = scmp.lt.s32.totalorder %s132_s1, %s132_s1 }
  0x1c   :  { %v53_v5 = vsel %vm49_vm0, 2.0, %v213_v4  ;;  %vm50_vm3 = vcmp.ge.f32.partialorder %v46_v6, 0.58431375  ;;  %v94_v10 = vsub.f32 %v40_v2, %v46_v6  ;;  %v47_v11 = vld [vmem:[#allocation5 + $0x10] sm:$0xff]  ;;  %vm81_vm4 = vcmp.ge.f32.partialorder %v45_v1, 0.34901962 }
  0x1d   :  { %v61_v8 = vadd.f32 3.0, %v53_v5  ;;  %v97_v9 = vand.u32 2147483647, %v93_v3  ;;  %v54_v12 = vsel %vm50_vm3, 2.0, %v213_v4  ;;  %vm58_vm5 = vcmp.ge.f32.partialorder %v46_v6, 0.5058824 }
  0x1e   :  { %v62_v15 = vadd.f32 3.0, %v54_v12  ;;  %vm70_vm6 = vcmp.ge.f32.partialorder %v46_v6, 0.44705883  ;;  %v98_v17 = vand.u32 2147483647, %v94_v10  ;;  %v95_v18 = vsub.f32 %v41_v7, %v47_v11  ;;  %v42_v19 = vld [vmem:[#allocation2 + $0x18] sm:$0xff] }
  0x1f   :  { %v65_v13 = vsel %vm57_vm1, %v61_v8, %v53_v5  ;;  %v101_v14 = vadd.f32 1.0, %v97_v9  ;;  %vm51_vm7 = vcmp.ge.f32.partialorder %v47_v11, 0.58431375  ;;  %vm59_vm8 = vcmp.ge.f32.partialorder %v47_v11, 0.5058824  ;;  %v48_v27 = vld [vmem:[#allocation5 + $0x18] sm:$0xff] }
  0x20   :  { %v73_v16 = vadd.f32 5.0, %v65_v13  ;;  %v66_v21 = vsel %vm58_vm5, %v62_v15, %v54_v12  ;;  %v55_v22 = vsel %vm51_vm7, 2.0, %v213_v4  ;;  %v102_v25 = vadd.f32 1.0, %v98_v17  ;;  %s185_s19 = scalar_lea.vmem %s132_s1, 512 }
  0x21   :  { %v105_v20 = vmul.f32 %v101_v14, %v97_v9  ;;  %v74_v24 = vadd.f32 5.0, %v66_v21  ;;  %v63_v26 = vadd.f32 3.0, %v55_v22  ;;  %vm82_vm9 = vcmp.ge.f32.partialorder %v46_v6, 0.34901962  ;;  %p186_p10 = scmp.ne.s32.totalorder %s132_s1, %s185_s19  ;;  %p191_p12 = scmp.lt.s32.totalorder %s185_s19, %s185_s19 }
  0x22   :  { %v77_v23 = vsel %vm69_vm2, %v73_v16, %v65_v13  ;;  %vm71_vm10 = vcmp.ge.f32.partialorder %v47_v11, 0.44705883  ;;  %v96_v29 = vsub.f32 %v42_v19, %v48_v27  ;;  %v106_v31 = vmul.f32 %v102_v25, %v98_v17 }
  0x23   :  { %v85_v28 = vadd.f32 20.0, %v77_v23  ;;  %v78_v30 = vsel %vm70_vm6, %v74_v24, %v66_v21  ;;  %v67_v32 = vsel %vm59_vm8, %v63_v26, %v55_v22  ;;  %v99_v33 = vand.u32 2147483647, %v95_v18  ;;  %p192_p13 = por %p191_p12, %p190_p11 }
  0x24   :  { %v86_v35 = vadd.f32 20.0, %v78_v30  ;;  %v75_v36 = vadd.f32 5.0, %v67_v32  ;;  %vm52_vm11 = vcmp.ge.f32.partialorder %v48_v27, 0.58431375  ;;  %vm60_vm12 = vcmp.ge.f32.partialorder %v48_v27, 0.5058824 }
  0x25   :  { %v89_v34 = vsel %vm81_vm4, %v85_v28, %v77_v23  ;;  %v103_v38 = vadd.f32 1.0, %v99_v33  ;;  %v56_v39 = vsel %vm52_vm11, 2.0, %v213_v4  ;;  %vm83_vm13 = vcmp.ge.f32.partialorder %v47_v11, 0.34901962  ;;  %p193_p0 = pnand %p192_p13, %p186_p10 }
  0x26   :  { %v109_v37 = vmul.f32 %v105_v20, %v89_v34  ;;  %v90_v40 = vsel %vm82_vm9, %v86_v35, %v78_v30  ;;  %v79_v41 = vsel %vm71_vm10, %v75_v36, %v67_v32  ;;  %v64_v42 = vadd.f32 3.0, %v56_v39 }
  0x27   :  { %v110_v43 = vmul.f32 %v106_v31, %v90_v40  ;;  %v87_v44 = vadd.f32 20.0, %v79_v41  ;;  %v107_v45 = vmul.f32 %v103_v38, %v99_v33  ;;  %vm72_vm14 = vcmp.ge.f32.partialorder %v48_v27, 0.44705883 }
  0x28   :  { %121 = vst [vmem:[#allocation7] sm:$0xff] %v109_v37  ;;  %v68_v46 = vsel %vm60_vm12, %v64_v42, %v56_v39  ;;  %v100_v47 = vand.u32 2147483647, %v96_v29  ;;  %vm84_vm15 = vcmp.ge.f32.partialorder %v48_v27, 0.34901962 }
  0x29   :  { %122 = vst [vmem:[#allocation7 + $0x8] sm:$0xff] %v110_v43  ;;  %v91_v48 = vsel %vm83_vm13, %v87_v44, %v79_v41  ;;  %v76_v49 = vadd.f32 5.0, %v68_v46 }
  0x2a   :  { %v111_v50 = vmul.f32 %v107_v45, %v91_v48  ;;  %v104_v51 = vadd.f32 1.0, %v100_v47 }
  0x2b   :  { %v80_v52 = vsel %vm72_vm14, %v76_v49, %v68_v46 }
  0x2c   :  { %123 = vst [vmem:[#allocation7 + $0x10] sm:$0xff] %v111_v50  ;;  %v88_v53 = vadd.f32 20.0, %v80_v52  ;;  %v108_v54 = vmul.f32 %v104_v51, %v100_v47 }
  0x2e   :  { %v92_v55 = vsel %vm84_vm15, %v88_v53, %v80_v52 }
  0x2f   :  { %v112_v56 = vmul.f32 %v108_v54, %v92_v55 }
  0x31   :  { %124 = vst [vmem:[#allocation7 + $0x18] sm:$0xff] %v112_v56 }
  0x32   :  { %196 = shalt.err (!%p193_p0)
}
  0x33   :  { %134 = dma.vmem_to_hbm [thread:$0]  %s132_s1, 512, %s244_s2, [#allocation4]  }
  0x34   :  { %209 = dma.done.wait [#allocation4], 512  }
  0x35   :  { %210 = vsyncadd [#allocation4], 4294966784 }
  0x36   :  { %138 = vsyncpa [#allocation3], 1 }
  0x37   :  { %139 = vsyncpa [#allocation6], 1 }
  0x38   :  { %140 = vsyncpa [#allocation4], 1 }

</bundles_post_ra>
